<compile_context>
chip_gen: v5e
topology: v5e:2x2
jax: 0.10.0
libtpu: 0.0.40
codegen_flags: <defaults>
</compile_context>

<pallas_src>
import jax
import jax.numpy as jnp
from jax import lax
from jax.experimental import pallas as pl
from jax.experimental.pallas import tpu as pltpu

EMBED_VOCAB = 5
EMBED_DIM = 10
HIDDEN = 32
N_CLASS = 3
OUT_LANES = 128                     # lane-dense padded logits width (>= N_CLASS)

# Gate order inside each 2H-wide block of the fused 8H gate axis follows the
# PyTorch LSTM order (i, f, g, o); each 2H block is [fwd(H) | bwd(H)].
# sigmoid(x) = 0.5*tanh(0.5*x) + 0.5  ->  prescale 0.5 folded into the weights,
# output affine (scale, shift) applied after a single tanh.
_GATE_PRESCALE = (0.5, 0.5, 1.0, 0.5)
_GATE_OUTSCALE = (0.5, 0.5, 1.0, 0.5)
_GATE_OUTSHIFT = (0.5, 0.5, 0.0, 0.5)


def _bilstm_fc_kernel(x_ref, lo_ref, hi_ref,
                      wih_ref, whh_ref, b_ref, gsc_ref, gof_ref,
                      fc1w_ref, fc1b_ref, fc2w_ref, fc2b_ref,
                      out_ref,
                      xp_ref):
    """Fused bidirectional layer-0 LSTM (packed-sequence masking) + FC head.

    x_ref:   (T*Bp, 2E) bf16, row t*Bp+b = [embed(t, b) | embed(T-1-t, b)]
             (forward stream | time-reversed stream).
    lo/hi:   (Bp, 2H) i32 per-lane step-validity thresholds (fwd half | bwd half).
    wih:     (2E, 8H) bf16 fused, prescaled input->gate weights: rows 0:E feed
             the fwd lanes, rows E:2E feed the bwd lanes of every gate block.
    whh:     (2H, 8H) bf16 block-diagonal, prescaled recurrent weights.
    b:       (1, 8H) f32 fused biases (b_ih + b_hh, both directions, prescaled).
    gsc/gof: (1, 8H) f32 per-lane affine so  act = gsc*tanh(z) + gof  yields
             sigmoid for i/f/o lanes and tanh for g lanes (one EUP push).
    fc1w:(2H,H) bf16  fc1b:(1,H) f32  fc2w:(H,128) bf16 zero-padded  fc2b:(1,128) f32
    out_ref: (Bp, 128) f32 lane-dense logits (cols >= N_CLASS come from zero pads).
    xp_ref:  (T*Bp, 8H) bf16 VMEM scratch: hoisted input projections, both dirs.
    """
    TBp = x_ref.shape[0]
    Bp = out_ref.shape[0]
    T = TBp // Bp
    H2 = lo_ref.shape[1]                      # 2*H (fwd|bwd concatenated width)

    # ---- hoisted input->hidden projection: ONE dense matmul for both
    #      directions (bwd stream already time-reversed), biases folded in.
    xp_ref[...] = (jnp.dot(x_ref[...], wih_ref[...],
                           preferred_element_type=jnp.float32)
                   + b_ref[...]).astype(jnp.bfloat16)

    # ---- hoisted loop invariants (no per-step broadcast re-materialization).
    whh = whh_ref[...]
    gsc = gsc_ref[...]
    gof = gof_ref[...]
    lo = lo_ref[...]
    hi = hi_ref[...]

    h0 = jnp.zeros((Bp, H2), jnp.float32)
    c0 = jnp.zeros((Bp, H2), jnp.float32)

    def step(s, carry):
        # Fused step: fwd lanes consume time s, bwd lanes consume time T-1-s
        # (the projection row already interleaves both).
        h, c = carry                                          # (Bp, 2H) f32
        row = pl.multiple_of(s * Bp, 8)                       # Bp % 8 == 0
        xp = xp_ref[pl.ds(row, Bp), :].astype(jnp.float32)    # (Bp, 8H)
        z = (jnp.dot(h.astype(jnp.bfloat16), whh,
                     preferred_element_type=jnp.float32) + xp)
        a = gsc * jnp.tanh(z) + gof        # all gates, both dirs: one EUP push
        i_g = a[:, 0 * H2:1 * H2]
        f_g = a[:, 1 * H2:2 * H2]
        g_g = a[:, 2 * H2:3 * H2]
        o_g = a[:, 3 * H2:4 * H2]
        c_new = f_g * c + i_g * g_g
        h_new = o_g * jnp.tanh(c_new)
        # Packed-sequence masking: hold state on invalid steps (per direction).
        valid = (s >= lo) & (s < hi)                          # (Bp, 2H) bool
        return jnp.where(valid, h_new, h), jnp.where(valid, c_new, c)

    h_fin, _ = lax.fori_loop(0, T, step, (h0, c0), unroll=min(T, 8))

    # ---- FC head on cat([h_fwd, h_bwd]) == h_fin (dropout == identity in eval).
    y = (jnp.dot(h_fin.astype(jnp.bfloat16), fc1w_ref[...],
                 preferred_element_type=jnp.float32) + fc1b_ref[...])     # (Bp, H)
    out_ref[...] = (jnp.dot(y.astype(jnp.bfloat16), fc2w_ref[...],
                            preferred_element_type=jnp.float32) + fc2b_ref[...])


def _prepare_kernel_params(params, T, B_pad, lens_pad):
    """Fold gate prescales, fuse fwd/bwd weights into the gate-major layout
    (one combined (2E,8H) input weight for the fwd + time-reversed streams),
    build per-lane activation affine, validity thresholds and padded FC head."""
    H, E = HIDDEN, EMBED_DIM
    zHH = jnp.zeros((H, H), jnp.float32)
    zEH = jnp.zeros((E, H), jnp.float32)

    whh_c, wih_c, b_c, gsc_c, gof_c = [], [], [], [], []
    for k in range(4):                                   # gates i, f, g, o
        s = _GATE_PRESCALE[k]
        wf_hh = params["whh_f"][:, k * H:(k + 1) * H] * s
        wb_hh = params["whh_b"][:, k * H:(k + 1) * H] * s
        # block-diagonal recurrent weight: rows [0:H) <- h_f, rows [H:2H) <- h_b
        whh_c += [jnp.concatenate([wf_hh, zHH], axis=0),
                  jnp.concatenate([zHH, wb_hh], axis=0)]
        wf_ih = params["wih_f"][:, k * H:(k + 1) * H] * s
        wb_ih = params["wih_b"][:, k * H:(k + 1) * H] * s
        # combined input weight: rows [0:E) <- forward stream, rows [E:2E) <-
        # time-reversed stream (feeds the bwd lanes of each gate block).
        wih_c += [jnp.concatenate([wf_ih, zEH], axis=0),
                  jnp.concatenate([zEH, wb_ih], axis=0)]
        b_c += [params["b_f"][:, k * H:(k + 1) * H] * s,
                params["b_b"][:, k * H:(k + 1) * H] * s]
        gsc_c.append(jnp.full((1, 2 * H), _GATE_OUTSCALE[k], jnp.float32))
        gof_c.append(jnp.full((1, 2 * H), _GATE_OUTSHIFT[k], jnp.float32))

    whh = jnp.concatenate(whh_c, axis=1).astype(jnp.bfloat16)     # (2H, 8H)
    wih = jnp.concatenate(wih_c, axis=1).astype(jnp.bfloat16)     # (2E, 8H)
    b = jnp.concatenate(b_c, axis=1)                              # (1, 8H) f32
    gsc = jnp.concatenate(gsc_c, axis=1)                          # (1, 8H) f32
    gof = jnp.concatenate(gof_c, axis=1)

    # Step-validity thresholds: fwd lanes valid while s < len,
    # bwd lanes valid while s >= T - len (they process time T-1-s).
    lens32 = lens_pad.astype(jnp.int32)
    lo = jnp.concatenate(
        [jnp.zeros((B_pad, H), jnp.int32),
         jnp.broadcast_to((T - lens32)[:, None], (B_pad, H))], axis=1)
    hi = jnp.concatenate(
        [jnp.broadcast_to(lens32[:, None], (B_pad, H)),
         jnp.full((B_pad, H), T, jnp.int32)], axis=1)

    fc1w = params["fc1w"].astype(jnp.bfloat16)                    # (2H, H)
    fc1b = params["fc1b"]                                         # (1, H)
    fc2w = (jnp.zeros((H, OUT_LANES), jnp.float32)
            .at[:, :N_CLASS].set(params["fc2w"]).astype(jnp.bfloat16))
    fc2b = jnp.zeros((1, OUT_LANES), jnp.float32).at[:, :N_CLASS].set(params["fc2b"])
    return (wih, whh, b, gsc, gof, lo, hi, fc1w, fc1b, fc2w, fc2b)


def lstm_model_forward(params, batch_data, batch_lens):
    """Returns (x, x_embed) with x: (1, B, n_class), x_embed: (B, T, embed_dim)."""
    B, T, _ = batch_data.shape
    B_pad = max(8, ((B + 7) // 8) * 8)        # sublane-align the batch
    E = EMBED_DIM

    # Glue (embedding lookup + layout) in plain JAX.
    tok = batch_data[:, :, 0].astype(jnp.int32)
    x_embed = params["embedding"][tok]                        # (B, T, E) f32
    x_tm = jnp.transpose(x_embed, (1, 0, 2))                  # (T, B, E)
    # Backward direction consumes time T-1-s at step s: concatenate the
    # time-reversed stream along the feature axis so ONE projection row per
    # step feeds both directions.
    x_cat = jnp.concatenate([x_tm, x_tm[::-1]], axis=2)       # (T, B, 2E)
    x_pad = jnp.zeros((T, B_pad, 2 * E), jnp.float32).at[:, :B, :].set(x_cat)
    x_flat = x_pad.reshape(T * B_pad, 2 * E).astype(jnp.bfloat16)

    lens_pad = jnp.zeros((B_pad,), jnp.int32).at[:B].set(batch_lens.astype(jnp.int32))
    (wih, whh, b, gsc, gof, lo, hi,
     fc1w, fc1b, fc2w, fc2b) = _prepare_kernel_params(params, T, B_pad, lens_pad)

    vmem = pl.BlockSpec(memory_space=pltpu.MemorySpace.VMEM)
    out = pl.pallas_call(
        _bilstm_fc_kernel,
        out_shape=jax.ShapeDtypeStruct((B_pad, OUT_LANES), jnp.float32),
        in_specs=[vmem] * 12,
        out_specs=vmem,
        scratch_shapes=[pltpu.VMEM((T * B_pad, 8 * HIDDEN), jnp.bfloat16)],
    )(x_flat, lo, hi, wih, whh, b, gsc, gof, fc1w, fc1b, fc2w, fc2b)

    logits = out[:B, :N_CLASS]
    return logits[None, :, :], x_embed                        # (1, B, C), (B, T, E)


def _reference_forward(params, batch_data, batch_lens):
    """Pure-JAX f32 reference (packed bidirectional layer-0 LSTM + FC head)."""
    H = HIDDEN
    tok = batch_data[:, :, 0].astype(jnp.int32)
    x_embed = params["embedding"][tok]
    B, T, _ = x_embed.shape
    lens = batch_lens.astype(jnp.int32)

    def cell(x_t, h, c, wih, whh, b):
        g = x_t @ wih + h @ whh + b
        i = jax.nn.sigmoid(g[:, 0 * H:1 * H])
        f = jax.nn.sigmoid(g[:, 1 * H:2 * H])
        gg = jnp.tanh(g[:, 2 * H:3 * H])
        o = jax.nn.sigmoid(g[:, 3 * H:4 * H])
        c2 = f * c + i * gg
        return o * jnp.tanh(c2), c2

    h_f = c_f = jnp.zeros((B, H), jnp.float32)
    for t in range(T):
        hn, cn = cell(x_embed[:, t], h_f, c_f,
                      params["wih_f"], params["whh_f"], params["b_f"])
        m = (t < lens)[:, None]
        h_f = jnp.where(m, hn, h_f)
        c_f = jnp.where(m, cn, c_f)
    h_b = c_b = jnp.zeros((B, H), jnp.float32)
    for t in range(T - 1, -1, -1):
        hn, cn = cell(x_embed[:, t], h_b, c_b,
                      params["wih_b"], params["whh_b"], params["b_b"])
        m = (t < lens)[:, None]
        h_b = jnp.where(m, hn, h_b)
        c_b = jnp.where(m, cn, c_b)
    hid = jnp.concatenate([h_f, h_b], axis=1)
    y = hid @ params["fc1w"] + params["fc1b"]
    x = y @ params["fc2w"] + params["fc2b"]
    return x[None], x_embed


def init_params(key):
    ks = jax.random.split(key, 16)
    kH = 1.0 / jnp.sqrt(jnp.float32(HIDDEN))
    k2H = 1.0 / jnp.sqrt(jnp.float32(2 * HIDDEN))

    def u(k, shape, b):
        return jax.random.uniform(k, shape, jnp.float32, -b, b)

    return {
        # nn.Embedding(5, 10): N(0, 1)
        "embedding": jax.random.normal(ks[0], (EMBED_VOCAB, EMBED_DIM), jnp.float32),
        # LSTM layer 0 (fwd/bwd), stored pre-transposed for x @ W; bias = b_ih + b_hh
        "wih_f": u(ks[1], (EMBED_DIM, 4 * HIDDEN), kH),
        "whh_f": u(ks[2], (HIDDEN, 4 * HIDDEN), kH),
        "b_f":   u(ks[3], (1, 4 * HIDDEN), kH) + u(ks[4], (1, 4 * HIDDEN), kH),
        "wih_b": u(ks[5], (EMBED_DIM, 4 * HIDDEN), kH),
        "whh_b": u(ks[6], (HIDDEN, 4 * HIDDEN), kH),
        "b_b":   u(ks[7], (1, 4 * HIDDEN), kH) + u(ks[8], (1, 4 * HIDDEN), kH),
        # fc1: Linear(2H, H), fc2: Linear(H, n_class), stored pre-transposed
        "fc1w":  u(ks[9],  (2 * HIDDEN, HIDDEN), k2H),
        "fc1b":  u(ks[10], (1, HIDDEN), k2H),
        "fc2w":  u(ks[11], (HIDDEN, N_CLASS), kH),
        "fc2b":  u(ks[12], (1, N_CLASS), kH),
    }


if __name__ == "__main__":
    key = jax.random.PRNGKey(0)
    pkey, tkey, fkey = jax.random.split(key, 3)
    params = init_params(pkey)

    B, T, F = 2, 8, 4      # only col 0 is used when embed=True, add_feat=False
    tokens = jax.random.randint(tkey, (B, T, 1), 0, EMBED_VOCAB).astype(jnp.float32)
    feats = jax.random.normal(fkey, (B, T, F - 1), jnp.float32)
    batch_data = jnp.concatenate([tokens, feats], axis=2)       # (B, T, F)
    batch_lens = jnp.array([8, 5], dtype=jnp.int32)             # variable lengths

    fwd = jax.jit(lstm_model_forward)
    x_out, x_embed = fwd(params, batch_data, batch_lens)
    jax.block_until_ready((x_out, x_embed))
    assert x_out.shape == (1, B, N_CLASS) and x_embed.shape == (B, T, EMBED_DIM)

    # Correctness check vs. a pure-JAX f32 reference (bf16 MXU operands => loose tol).
    x_ref, emb_ref = _reference_forward(params, batch_data, batch_lens)
    err = float(jnp.max(jnp.abs(x_out - x_ref)))
    emb_err = float(jnp.max(jnp.abs(x_embed - emb_ref)))
    assert err < 5e-2 and emb_err < 1e-6, f"mismatch vs reference: {err}, {emb_err}"

    print("KERNEL_OK")
</pallas_src>

<mosaic_0001>
module attributes {stable_mosaic.version = 11 : i64} {
  func.func @_bilstm_fc_kernel(%arg0: memref<64x20xbf16, #tpu.memory_space<vmem>>, %arg1: memref<8x64xi32, #tpu.memory_space<vmem>>, %arg2: memref<8x64xi32, #tpu.memory_space<vmem>>, %arg3: memref<20x256xbf16, #tpu.memory_space<vmem>>, %arg4: memref<64x256xbf16, #tpu.memory_space<vmem>>, %arg5: memref<1x256xf32, #tpu.memory_space<vmem>>, %arg6: memref<1x256xf32, #tpu.memory_space<vmem>>, %arg7: memref<1x256xf32, #tpu.memory_space<vmem>>, %arg8: memref<64x32xbf16, #tpu.memory_space<vmem>>, %arg9: memref<1x32xf32, #tpu.memory_space<vmem>>, %arg10: memref<32x128xbf16, #tpu.memory_space<vmem>>, %arg11: memref<1x128xf32, #tpu.memory_space<vmem>>, %arg12: memref<8x128xf32, #tpu.memory_space<vmem>>, %arg13: memref<64x256xbf16, #tpu.memory_space<vmem>>) attributes {dimension_semantics = [], scalar_prefetch = 0 : i64, scratch_operands = 1 : i64, tpu.core_type = #tpu.core_type<tc>} {
    %c0 = arith.constant 0 : index
    %c0_0 = arith.constant 0 : index
    %0 = vector.load %arg0[%c0, %c0_0] : memref<64x20xbf16, #tpu.memory_space<vmem>>, vector<64x20xbf16>
    %c0_1 = arith.constant 0 : index
    %c0_2 = arith.constant 0 : index
    %1 = vector.load %arg3[%c0_1, %c0_2] : memref<20x256xbf16, #tpu.memory_space<vmem>>, vector<20x256xbf16>
    %cst = arith.constant dense<0.000000e+00> : vector<64x256xf32>
    %2 = tpu.matmul %0, %1, %cst {dimension_numbers = #tpu.dot_dimension_numbers<[1], [0], [0], [1], [0, 0, 1, 1], [], []>} : vector<64x20xbf16>, vector<20x256xbf16>, vector<64x256xf32> -> vector<64x256xf32>
    %c0_3 = arith.constant 0 : index
    %c0_4 = arith.constant 0 : index
    %3 = vector.load %arg5[%c0_3, %c0_4] : memref<1x256xf32, #tpu.memory_space<vmem>>, vector<1x256xf32>
    %4 = vector.broadcast %3 : vector<1x256xf32> to vector<64x256xf32>
    %5 = arith.addf %2, %4 : vector<64x256xf32>
    %6 = arith.truncf %5 : vector<64x256xf32> to vector<64x256xbf16>
    %c0_5 = arith.constant 0 : index
    %c0_6 = arith.constant 0 : index
    %7 = vector.load %arg13[%c0_5, %c0_6] : memref<64x256xbf16, #tpu.memory_space<vmem>>, vector<64x256xbf16>
    tpu.vector_store %arg13[%c0_5, %c0_6], %6 {strides = array<i32>} : memref<64x256xbf16, #tpu.memory_space<vmem>>, vector<64x256xbf16>,
    %c0_7 = arith.constant 0 : index
    %c0_8 = arith.constant 0 : index
    %8 = vector.load %arg4[%c0_7, %c0_8] : memref<64x256xbf16, #tpu.memory_space<vmem>>, vector<64x256xbf16>
    %c0_9 = arith.constant 0 : index
    %c0_10 = arith.constant 0 : index
    %9 = vector.load %arg6[%c0_9, %c0_10] : memref<1x256xf32, #tpu.memory_space<vmem>>, vector<1x256xf32>
    %c0_11 = arith.constant 0 : index
    %c0_12 = arith.constant 0 : index
    %10 = vector.load %arg7[%c0_11, %c0_12] : memref<1x256xf32, #tpu.memory_space<vmem>>, vector<1x256xf32>
    %c0_13 = arith.constant 0 : index
    %c0_14 = arith.constant 0 : index
    %11 = vector.load %arg1[%c0_13, %c0_14] : memref<8x64xi32, #tpu.memory_space<vmem>>, vector<8x64xi32>
    %c0_15 = arith.constant 0 : index
    %c0_16 = arith.constant 0 : index
    %12 = vector.load %arg2[%c0_15, %c0_16] : memref<8x64xi32, #tpu.memory_space<vmem>>, vector<8x64xi32>
    %cst_17 = arith.constant 0.000000e+00 : f32
    %13 = vector.broadcast %cst_17 : f32 to vector<8x64xf32>
    %cst_18 = arith.constant 0.000000e+00 : f32
    %14 = vector.broadcast %cst_18 : f32 to vector<8x64xf32>
    %c0_i32 = arith.constant 0 : i32
    %c8_i32 = arith.constant 8 : i32
    %15 = arith.muli %c0_i32, %c8_i32 : i32
    %16 = tpu.assume_multiple %15, 8 : i32
    %17 = arith.index_cast %16 : i32 to index
    %c0_19 = arith.constant 0 : index
    %18 = vector.load %arg13[%17, %c0_19] : memref<64x256xbf16, #tpu.memory_space<vmem>>, vector<8x256xbf16>
    %19 = arith.extf %18 : vector<8x256xbf16> to vector<8x256xf32>
    %20 = arith.truncf %13 : vector<8x64xf32> to vector<8x64xbf16>
    %cst_20 = arith.constant dense<0.000000e+00> : vector<8x256xf32>
    %21 = tpu.matmul %20, %8, %cst_20 {dimension_numbers = #tpu.dot_dimension_numbers<[1], [0], [0], [1], [0, 0, 1, 1], [], []>} : vector<8x64xbf16>, vector<64x256xbf16>, vector<8x256xf32> -> vector<8x256xf32>
    %22 = arith.addf %21, %19 : vector<8x256xf32>
    %23 = math.tanh %22 : vector<8x256xf32>
    %24 = vector.broadcast %9 : vector<1x256xf32> to vector<8x256xf32>
    %25 = arith.mulf %24, %23 : vector<8x256xf32>
    %26 = vector.broadcast %10 : vector<1x256xf32> to vector<8x256xf32>
    %27 = arith.addf %25, %26 : vector<8x256xf32>
    %28 = vector.extract_strided_slice %27 {offsets = [0, 0], sizes = [8, 64], strides = [1, 1]} : vector<8x256xf32> to vector<8x64xf32>
    %29 = vector.extract_strided_slice %27 {offsets = [0, 64], sizes = [8, 64], strides = [1, 1]} : vector<8x256xf32> to vector<8x64xf32>
    %30 = vector.extract_strided_slice %27 {offsets = [0, 128], sizes = [8, 64], strides = [1, 1]} : vector<8x256xf32> to vector<8x64xf32>
    %31 = vector.extract_strided_slice %27 {offsets = [0, 192], sizes = [8, 64], strides = [1, 1]} : vector<8x256xf32> to vector<8x64xf32>
    %32 = arith.mulf %29, %14 : vector<8x64xf32>
    %33 = arith.mulf %28, %30 : vector<8x64xf32>
    %34 = arith.addf %32, %33 : vector<8x64xf32>
    %35 = math.tanh %34 : vector<8x64xf32>
    %36 = arith.mulf %31, %35 : vector<8x64xf32>
    %37 = vector.broadcast %c0_i32 : i32 to vector<8x64xi32>
    %38 = arith.cmpi sge, %37, %11 : vector<8x64xi32>
    %39 = vector.broadcast %c0_i32 : i32 to vector<8x64xi32>
    %40 = arith.cmpi slt, %39, %12 : vector<8x64xi32>
    %41 = arith.andi %38, %40 : vector<8x64xi1>
    %42 = arith.select %41, %36, %13 : vector<8x64xi1>, vector<8x64xf32>
    %43 = arith.select %41, %34, %14 : vector<8x64xi1>, vector<8x64xf32>
    %c1_i32 = arith.constant 1 : i32
    %c8_i32_21 = arith.constant 8 : i32
    %44 = arith.muli %c1_i32, %c8_i32_21 : i32
    %45 = tpu.assume_multiple %44, 8 : i32
    %46 = arith.index_cast %45 : i32 to index
    %c0_22 = arith.constant 0 : index
    %47 = vector.load %arg13[%46, %c0_22] : memref<64x256xbf16, #tpu.memory_space<vmem>>, vector<8x256xbf16>
    %48 = arith.extf %47 : vector<8x256xbf16> to vector<8x256xf32>
    %49 = arith.truncf %42 : vector<8x64xf32> to vector<8x64xbf16>
    %cst_23 = arith.constant dense<0.000000e+00> : vector<8x256xf32>
    %50 = tpu.matmul %49, %8, %cst_23 {dimension_numbers = #tpu.dot_dimension_numbers<[1], [0], [0], [1], [0, 0, 1, 1], [], []>} : vector<8x64xbf16>, vector<64x256xbf16>, vector<8x256xf32> -> vector<8x256xf32>
    %51 = arith.addf %50, %48 : vector<8x256xf32>
    %52 = math.tanh %51 : vector<8x256xf32>
    %53 = vector.broadcast %9 : vector<1x256xf32> to vector<8x256xf32>
    %54 = arith.mulf %53, %52 : vector<8x256xf32>
    %55 = vector.broadcast %10 : vector<1x256xf32> to vector<8x256xf32>
    %56 = arith.addf %54, %55 : vector<8x256xf32>
    %57 = vector.extract_strided_slice %56 {offsets = [0, 0], sizes = [8, 64], strides = [1, 1]} : vector<8x256xf32> to vector<8x64xf32>
    %58 = vector.extract_strided_slice %56 {offsets = [0, 64], sizes = [8, 64], strides = [1, 1]} : vector<8x256xf32> to vector<8x64xf32>
    %59 = vector.extract_strided_slice %56 {offsets = [0, 128], sizes = [8, 64], strides = [1, 1]} : vector<8x256xf32> to vector<8x64xf32>
    %60 = vector.extract_strided_slice %56 {offsets = [0, 192], sizes = [8, 64], strides = [1, 1]} : vector<8x256xf32> to vector<8x64xf32>
    %61 = arith.mulf %58, %43 : vector<8x64xf32>
    %62 = arith.mulf %57, %59 : vector<8x64xf32>
    %63 = arith.addf %61, %62 : vector<8x64xf32>
    %64 = math.tanh %63 : vector<8x64xf32>
    %65 = arith.mulf %60, %64 : vector<8x64xf32>
    %66 = vector.broadcast %c1_i32 : i32 to vector<8x64xi32>
    %67 = arith.cmpi sge, %66, %11 : vector<8x64xi32>
    %68 = vector.broadcast %c1_i32 : i32 to vector<8x64xi32>
    %69 = arith.cmpi slt, %68, %12 : vector<8x64xi32>
    %70 = arith.andi %67, %69 : vector<8x64xi1>
    %71 = arith.select %70, %65, %42 : vector<8x64xi1>, vector<8x64xf32>
    %72 = arith.select %70, %63, %43 : vector<8x64xi1>, vector<8x64xf32>
    %c2_i32 = arith.constant 2 : i32
    %c8_i32_24 = arith.constant 8 : i32
    %73 = arith.muli %c2_i32, %c8_i32_24 : i32
    %74 = tpu.assume_multiple %73, 8 : i32
    %75 = arith.index_cast %74 : i32 to index
    %c0_25 = arith.constant 0 : index
    %76 = vector.load %arg13[%75, %c0_25] : memref<64x256xbf16, #tpu.memory_space<vmem>>, vector<8x256xbf16>
    %77 = arith.extf %76 : vector<8x256xbf16> to vector<8x256xf32>
    %78 = arith.truncf %71 : vector<8x64xf32> to vector<8x64xbf16>
    %cst_26 = arith.constant dense<0.000000e+00> : vector<8x256xf32>
    %79 = tpu.matmul %78, %8, %cst_26 {dimension_numbers = #tpu.dot_dimension_numbers<[1], [0], [0], [1], [0, 0, 1, 1], [], []>} : vector<8x64xbf16>, vector<64x256xbf16>, vector<8x256xf32> -> vector<8x256xf32>
    %80 = arith.addf %79, %77 : vector<8x256xf32>
    %81 = math.tanh %80 : vector<8x256xf32>
    %82 = vector.broadcast %9 : vector<1x256xf32> to vector<8x256xf32>
    %83 = arith.mulf %82, %81 : vector<8x256xf32>
    %84 = vector.broadcast %10 : vector<1x256xf32> to vector<8x256xf32>
    %85 = arith.addf %83, %84 : vector<8x256xf32>
    %86 = vector.extract_strided_slice %85 {offsets = [0, 0], sizes = [8, 64], strides = [1, 1]} : vector<8x256xf32> to vector<8x64xf32>
    %87 = vector.extract_strided_slice %85 {offsets = [0, 64], sizes = [8, 64], strides = [1, 1]} : vector<8x256xf32> to vector<8x64xf32>
    %88 = vector.extract_strided_slice %85 {offsets = [0, 128], sizes = [8, 64], strides = [1, 1]} : vector<8x256xf32> to vector<8x64xf32>
    %89 = vector.extract_strided_slice %85 {offsets = [0, 192], sizes = [8, 64], strides = [1, 1]} : vector<8x256xf32> to vector<8x64xf32>
    %90 = arith.mulf %87, %72 : vector<8x64xf32>
    %91 = arith.mulf %86, %88 : vector<8x64xf32>
    %92 = arith.addf %90, %91 : vector<8x64xf32>
    %93 = math.tanh %92 : vector<8x64xf32>
    %94 = arith.mulf %89, %93 : vector<8x64xf32>
    %95 = vector.broadcast %c2_i32 : i32 to vector<8x64xi32>
    %96 = arith.cmpi sge, %95, %11 : vector<8x64xi32>
    %97 = vector.broadcast %c2_i32 : i32 to vector<8x64xi32>
    %98 = arith.cmpi slt, %97, %12 : vector<8x64xi32>
    %99 = arith.andi %96, %98 : vector<8x64xi1>
    %100 = arith.select %99, %94, %71 : vector<8x64xi1>, vector<8x64xf32>
    %101 = arith.select %99, %92, %72 : vector<8x64xi1>, vector<8x64xf32>
    %c3_i32 = arith.constant 3 : i32
    %c8_i32_27 = arith.constant 8 : i32
    %102 = arith.muli %c3_i32, %c8_i32_27 : i32
    %103 = tpu.assume_multiple %102, 8 : i32
    %104 = arith.index_cast %103 : i32 to index
    %c0_28 = arith.constant 0 : index
    %105 = vector.load %arg13[%104, %c0_28] : memref<64x256xbf16, #tpu.memory_space<vmem>>, vector<8x256xbf16>
    %106 = arith.extf %105 : vector<8x256xbf16> to vector<8x256xf32>
    %107 = arith.truncf %100 : vector<8x64xf32> to vector<8x64xbf16>
    %cst_29 = arith.constant dense<0.000000e+00> : vector<8x256xf32>
    %108 = tpu.matmul %107, %8, %cst_29 {dimension_numbers = #tpu.dot_dimension_numbers<[1], [0], [0], [1], [0, 0, 1, 1], [], []>} : vector<8x64xbf16>, vector<64x256xbf16>, vector<8x256xf32> -> vector<8x256xf32>
    %109 = arith.addf %108, %106 : vector<8x256xf32>
    %110 = math.tanh %109 : vector<8x256xf32>
    %111 = vector.broadcast %9 : vector<1x256xf32> to vector<8x256xf32>
    %112 = arith.mulf %111, %110 : vector<8x256xf32>
    %113 = vector.broadcast %10 : vector<1x256xf32> to vector<8x256xf32>
    %114 = arith.addf %112, %113 : vector<8x256xf32>
    %115 = vector.extract_strided_slice %114 {offsets = [0, 0], sizes = [8, 64], strides = [1, 1]} : vector<8x256xf32> to vector<8x64xf32>
    %116 = vector.extract_strided_slice %114 {offsets = [0, 64], sizes = [8, 64], strides = [1, 1]} : vector<8x256xf32> to vector<8x64xf32>
    %117 = vector.extract_strided_slice %114 {offsets = [0, 128], sizes = [8, 64], strides = [1, 1]} : vector<8x256xf32> to vector<8x64xf32>
    %118 = vector.extract_strided_slice %114 {offsets = [0, 192], sizes = [8, 64], strides = [1, 1]} : vector<8x256xf32> to vector<8x64xf32>
    %119 = arith.mulf %116, %101 : vector<8x64xf32>
    %120 = arith.mulf %115, %117 : vector<8x64xf32>
    %121 = arith.addf %119, %120 : vector<8x64xf32>
    %122 = math.tanh %121 : vector<8x64xf32>
    %123 = arith.mulf %118, %122 : vector<8x64xf32>
    %124 = vector.broadcast %c3_i32 : i32 to vector<8x64xi32>
    %125 = arith.cmpi sge, %124, %11 : vector<8x64xi32>
    %126 = vector.broadcast %c3_i32 : i32 to vector<8x64xi32>
    %127 = arith.cmpi slt, %126, %12 : vector<8x64xi32>
    %128 = arith.andi %125, %127 : vector<8x64xi1>
    %129 = arith.select %128, %123, %100 : vector<8x64xi1>, vector<8x64xf32>
    %130 = arith.select %128, %121, %101 : vector<8x64xi1>, vector<8x64xf32>
    %c4_i32 = arith.constant 4 : i32
    %c8_i32_30 = arith.constant 8 : i32
    %131 = arith.muli %c4_i32, %c8_i32_30 : i32
    %132 = tpu.assume_multiple %131, 8 : i32
    %133 = arith.index_cast %132 : i32 to index
    %c0_31 = arith.constant 0 : index
    %134 = vector.load %arg13[%133, %c0_31] : memref<64x256xbf16, #tpu.memory_space<vmem>>, vector<8x256xbf16>
    %135 = arith.extf %134 : vector<8x256xbf16> to vector<8x256xf32>
    %136 = arith.truncf %129 : vector<8x64xf32> to vector<8x64xbf16>
    %cst_32 = arith.constant dense<0.000000e+00> : vector<8x256xf32>
    %137 = tpu.matmul %136, %8, %cst_32 {dimension_numbers = #tpu.dot_dimension_numbers<[1], [0], [0], [1], [0, 0, 1, 1], [], []>} : vector<8x64xbf16>, vector<64x256xbf16>, vector<8x256xf32> -> vector<8x256xf32>
    %138 = arith.addf %137, %135 : vector<8x256xf32>
    %139 = math.tanh %138 : vector<8x256xf32>
    %140 = vector.broadcast %9 : vector<1x256xf32> to vector<8x256xf32>
    %141 = arith.mulf %140, %139 : vector<8x256xf32>
    %142 = vector.broadcast %10 : vector<1x256xf32> to vector<8x256xf32>
    %143 = arith.addf %141, %142 : vector<8x256xf32>
    %144 = vector.extract_strided_slice %143 {offsets = [0, 0], sizes = [8, 64], strides = [1, 1]} : vector<8x256xf32> to vector<8x64xf32>
    %145 = vector.extract_strided_slice %143 {offsets = [0, 64], sizes = [8, 64], strides = [1, 1]} : vector<8x256xf32> to vector<8x64xf32>
    %146 = vector.extract_strided_slice %143 {offsets = [0, 128], sizes = [8, 64], strides = [1, 1]} : vector<8x256xf32> to vector<8x64xf32>
    %147 = vector.extract_strided_slice %143 {offsets = [0, 192], sizes = [8, 64], strides = [1, 1]} : vector<8x256xf32> to vector<8x64xf32>
    %148 = arith.mulf %145, %130 : vector<8x64xf32>
    %149 = arith.mulf %144, %146 : vector<8x64xf32>
    %150 = arith.addf %148, %149 : vector<8x64xf32>
    %151 = math.tanh %150 : vector<8x64xf32>
    %152 = arith.mulf %147, %151 : vector<8x64xf32>
    %153 = vector.broadcast %c4_i32 : i32 to vector<8x64xi32>
    %154 = arith.cmpi sge, %153, %11 : vector<8x64xi32>
    %155 = vector.broadcast %c4_i32 : i32 to vector<8x64xi32>
    %156 = arith.cmpi slt, %155, %12 : vector<8x64xi32>
    %157 = arith.andi %154, %156 : vector<8x64xi1>
    %158 = arith.select %157, %152, %129 : vector<8x64xi1>, vector<8x64xf32>
    %159 = arith.select %157, %150, %130 : vector<8x64xi1>, vector<8x64xf32>
    %c5_i32 = arith.constant 5 : i32
    %c8_i32_33 = arith.constant 8 : i32
    %160 = arith.muli %c5_i32, %c8_i32_33 : i32
    %161 = tpu.assume_multiple %160, 8 : i32
    %162 = arith.index_cast %161 : i32 to index
    %c0_34 = arith.constant 0 : index
    %163 = vector.load %arg13[%162, %c0_34] : memref<64x256xbf16, #tpu.memory_space<vmem>>, vector<8x256xbf16>
    %164 = arith.extf %163 : vector<8x256xbf16> to vector<8x256xf32>
    %165 = arith.truncf %158 : vector<8x64xf32> to vector<8x64xbf16>
    %cst_35 = arith.constant dense<0.000000e+00> : vector<8x256xf32>
    %166 = tpu.matmul %165, %8, %cst_35 {dimension_numbers = #tpu.dot_dimension_numbers<[1], [0], [0], [1], [0, 0, 1, 1], [], []>} : vector<8x64xbf16>, vector<64x256xbf16>, vector<8x256xf32> -> vector<8x256xf32>
    %167 = arith.addf %166, %164 : vector<8x256xf32>
    %168 = math.tanh %167 : vector<8x256xf32>
    %169 = vector.broadcast %9 : vector<1x256xf32> to vector<8x256xf32>
    %170 = arith.mulf %169, %168 : vector<8x256xf32>
    %171 = vector.broadcast %10 : vector<1x256xf32> to vector<8x256xf32>
    %172 = arith.addf %170, %171 : vector<8x256xf32>
    %173 = vector.extract_strided_slice %172 {offsets = [0, 0], sizes = [8, 64], strides = [1, 1]} : vector<8x256xf32> to vector<8x64xf32>
    %174 = vector.extract_strided_slice %172 {offsets = [0, 64], sizes = [8, 64], strides = [1, 1]} : vector<8x256xf32> to vector<8x64xf32>
    %175 = vector.extract_strided_slice %172 {offsets = [0, 128], sizes = [8, 64], strides = [1, 1]} : vector<8x256xf32> to vector<8x64xf32>
    %176 = vector.extract_strided_slice %172 {offsets = [0, 192], sizes = [8, 64], strides = [1, 1]} : vector<8x256xf32> to vector<8x64xf32>
    %177 = arith.mulf %174, %159 : vector<8x64xf32>
    %178 = arith.mulf %173, %175 : vector<8x64xf32>
    %179 = arith.addf %177, %178 : vector<8x64xf32>
    %180 = math.tanh %179 : vector<8x64xf32>
    %181 = arith.mulf %176, %180 : vector<8x64xf32>
    %182 = vector.broadcast %c5_i32 : i32 to vector<8x64xi32>
    %183 = arith.cmpi sge, %182, %11 : vector<8x64xi32>
    %184 = vector.broadcast %c5_i32 : i32 to vector<8x64xi32>
    %185 = arith.cmpi slt, %184, %12 : vector<8x64xi32>
    %186 = arith.andi %183, %185 : vector<8x64xi1>
    %187 = arith.select %186, %181, %158 : vector<8x64xi1>, vector<8x64xf32>
    %188 = arith.select %186, %179, %159 : vector<8x64xi1>, vector<8x64xf32>
    %c6_i32 = arith.constant 6 : i32
    %c8_i32_36 = arith.constant 8 : i32
    %189 = arith.muli %c6_i32, %c8_i32_36 : i32
    %190 = tpu.assume_multiple %189, 8 : i32
    %191 = arith.index_cast %190 : i32 to index
    %c0_37 = arith.constant 0 : index
    %192 = vector.load %arg13[%191, %c0_37] : memref<64x256xbf16, #tpu.memory_space<vmem>>, vector<8x256xbf16>
    %193 = arith.extf %192 : vector<8x256xbf16> to vector<8x256xf32>
    %194 = arith.truncf %187 : vector<8x64xf32> to vector<8x64xbf16>
    %cst_38 = arith.constant dense<0.000000e+00> : vector<8x256xf32>
    %195 = tpu.matmul %194, %8, %cst_38 {dimension_numbers = #tpu.dot_dimension_numbers<[1], [0], [0], [1], [0, 0, 1, 1], [], []>} : vector<8x64xbf16>, vector<64x256xbf16>, vector<8x256xf32> -> vector<8x256xf32>
    %196 = arith.addf %195, %193 : vector<8x256xf32>
    %197 = math.tanh %196 : vector<8x256xf32>
    %198 = vector.broadcast %9 : vector<1x256xf32> to vector<8x256xf32>
    %199 = arith.mulf %198, %197 : vector<8x256xf32>
    %200 = vector.broadcast %10 : vector<1x256xf32> to vector<8x256xf32>
    %201 = arith.addf %199, %200 : vector<8x256xf32>
    %202 = vector.extract_strided_slice %201 {offsets = [0, 0], sizes = [8, 64], strides = [1, 1]} : vector<8x256xf32> to vector<8x64xf32>
    %203 = vector.extract_strided_slice %201 {offsets = [0, 64], sizes = [8, 64], strides = [1, 1]} : vector<8x256xf32> to vector<8x64xf32>
    %204 = vector.extract_strided_slice %201 {offsets = [0, 128], sizes = [8, 64], strides = [1, 1]} : vector<8x256xf32> to vector<8x64xf32>
    %205 = vector.extract_strided_slice %201 {offsets = [0, 192], sizes = [8, 64], strides = [1, 1]} : vector<8x256xf32> to vector<8x64xf32>
    %206 = arith.mulf %203, %188 : vector<8x64xf32>
    %207 = arith.mulf %202, %204 : vector<8x64xf32>
    %208 = arith.addf %206, %207 : vector<8x64xf32>
    %209 = math.tanh %208 : vector<8x64xf32>
    %210 = arith.mulf %205, %209 : vector<8x64xf32>
    %211 = vector.broadcast %c6_i32 : i32 to vector<8x64xi32>
    %212 = arith.cmpi sge, %211, %11 : vector<8x64xi32>
    %213 = vector.broadcast %c6_i32 : i32 to vector<8x64xi32>
    %214 = arith.cmpi slt, %213, %12 : vector<8x64xi32>
    %215 = arith.andi %212, %214 : vector<8x64xi1>
    %216 = arith.select %215, %210, %187 : vector<8x64xi1>, vector<8x64xf32>
    %217 = arith.select %215, %208, %188 : vector<8x64xi1>, vector<8x64xf32>
    %c7_i32 = arith.constant 7 : i32
    %c8_i32_39 = arith.constant 8 : i32
    %218 = arith.muli %c7_i32, %c8_i32_39 : i32
    %219 = tpu.assume_multiple %218, 8 : i32
    %220 = arith.index_cast %219 : i32 to index
    %c0_40 = arith.constant 0 : index
    %221 = vector.load %arg13[%220, %c0_40] : memref<64x256xbf16, #tpu.memory_space<vmem>>, vector<8x256xbf16>
    %222 = arith.extf %221 : vector<8x256xbf16> to vector<8x256xf32>
    %223 = arith.truncf %216 : vector<8x64xf32> to vector<8x64xbf16>
    %cst_41 = arith.constant dense<0.000000e+00> : vector<8x256xf32>
    %224 = tpu.matmul %223, %8, %cst_41 {dimension_numbers = #tpu.dot_dimension_numbers<[1], [0], [0], [1], [0, 0, 1, 1], [], []>} : vector<8x64xbf16>, vector<64x256xbf16>, vector<8x256xf32> -> vector<8x256xf32>
    %225 = arith.addf %224, %222 : vector<8x256xf32>
    %226 = math.tanh %225 : vector<8x256xf32>
    %227 = vector.broadcast %9 : vector<1x256xf32> to vector<8x256xf32>
    %228 = arith.mulf %227, %226 : vector<8x256xf32>
    %229 = vector.broadcast %10 : vector<1x256xf32> to vector<8x256xf32>
    %230 = arith.addf %228, %229 : vector<8x256xf32>
    %231 = vector.extract_strided_slice %230 {offsets = [0, 0], sizes = [8, 64], strides = [1, 1]} : vector<8x256xf32> to vector<8x64xf32>
    %232 = vector.extract_strided_slice %230 {offsets = [0, 64], sizes = [8, 64], strides = [1, 1]} : vector<8x256xf32> to vector<8x64xf32>
    %233 = vector.extract_strided_slice %230 {offsets = [0, 128], sizes = [8, 64], strides = [1, 1]} : vector<8x256xf32> to vector<8x64xf32>
    %234 = vector.extract_strided_slice %230 {offsets = [0, 192], sizes = [8, 64], strides = [1, 1]} : vector<8x256xf32> to vector<8x64xf32>
    %235 = arith.mulf %232, %217 : vector<8x64xf32>
    %236 = arith.mulf %231, %233 : vector<8x64xf32>
    %237 = arith.addf %235, %236 : vector<8x64xf32>
    %238 = math.tanh %237 : vector<8x64xf32>
    %239 = arith.mulf %234, %238 : vector<8x64xf32>
    %240 = vector.broadcast %c7_i32 : i32 to vector<8x64xi32>
    %241 = arith.cmpi sge, %240, %11 : vector<8x64xi32>
    %242 = vector.broadcast %c7_i32 : i32 to vector<8x64xi32>
    %243 = arith.cmpi slt, %242, %12 : vector<8x64xi32>
    %244 = arith.andi %241, %243 : vector<8x64xi1>
    %245 = arith.select %244, %239, %216 : vector<8x64xi1>, vector<8x64xf32>
    %246 = arith.select %244, %237, %217 : vector<8x64xi1>, vector<8x64xf32>
    %c8_i32_42 = arith.constant 8 : i32
    %247 = arith.truncf %245 : vector<8x64xf32> to vector<8x64xbf16>
    %c0_43 = arith.constant 0 : index
    %c0_44 = arith.constant 0 : index
    %248 = vector.load %arg8[%c0_43, %c0_44] : memref<64x32xbf16, #tpu.memory_space<vmem>>, vector<64x32xbf16>
    %cst_45 = arith.constant dense<0.000000e+00> : vector<8x32xf32>
    %249 = tpu.matmul %247, %248, %cst_45 {dimension_numbers = #tpu.dot_dimension_numbers<[1], [0], [0], [1], [0, 0, 1, 1], [], []>} : vector<8x64xbf16>, vector<64x32xbf16>, vector<8x32xf32> -> vector<8x32xf32>
    %c0_46 = arith.constant 0 : index
    %c0_47 = arith.constant 0 : index
    %250 = vector.load %arg9[%c0_46, %c0_47] : memref<1x32xf32, #tpu.memory_space<vmem>>, vector<1x32xf32>
    %251 = vector.broadcast %250 : vector<1x32xf32> to vector<8x32xf32>
    %252 = arith.addf %249, %251 : vector<8x32xf32>
    %253 = arith.truncf %252 : vector<8x32xf32> to vector<8x32xbf16>
    %c0_48 = arith.constant 0 : index
    %c0_49 = arith.constant 0 : index
    %254 = vector.load %arg10[%c0_48, %c0_49] : memref<32x128xbf16, #tpu.memory_space<vmem>>, vector<32x128xbf16>
    %cst_50 = arith.constant dense<0.000000e+00> : vector<8x128xf32>
    %255 = tpu.matmul %253, %254, %cst_50 {dimension_numbers = #tpu.dot_dimension_numbers<[1], [0], [0], [1], [0, 0, 1, 1], [], []>} : vector<8x32xbf16>, vector<32x128xbf16>, vector<8x128xf32> -> vector<8x128xf32>
    %c0_51 = arith.constant 0 : index
    %c0_52 = arith.constant 0 : index
    %256 = vector.load %arg11[%c0_51, %c0_52] : memref<1x128xf32, #tpu.memory_space<vmem>>, vector<1x128xf32>
    %257 = vector.broadcast %256 : vector<1x128xf32> to vector<8x128xf32>
    %258 = arith.addf %255, %257 : vector<8x128xf32>
    %c0_53 = arith.constant 0 : index
    %c0_54 = arith.constant 0 : index
    %259 = vector.load %arg12[%c0_53, %c0_54] : memref<8x128xf32, #tpu.memory_space<vmem>>, vector<8x128xf32>
    tpu.vector_store %arg12[%c0_53, %c0_54], %258 {strides = array<i32>} : memref<8x128xf32, #tpu.memory_space<vmem>>, vector<8x128xf32>,
    return
  }
}

</mosaic_0001>

<bundles_post_ra>
// kernel: lstm_model_forward.1
= control target key start
LH: loop header
LB: loop body
LE: loop exit
PB: predicated region body
PF: predicated region fallthrough
CT: control target
= control target key end

     0   :  { %vm107_vm0 = vcmask 1041408   ;;  %vm94_vm1 = vcmask 162816   ;;  %v1064_v38 = vmov 0   ;;  %vm246_vm5 = vcmask 523264   ;;  %s1477_s4 = inlined_call_operand.vmem [shape: bf16[64,256], index: 4, kind: input, shape index: {}]   ;;  %s1478_s3 = inlined_call_operand.vmem [shape: bf16[20,256], index: 3, kind: input, shape index: {}]   ;;  %s1479_s0 = inlined_call_operand.vmem [shape: bf16[64,20], index: 0, kind: input, shape index: {}]   ;;  %s1480_s5 = inlined_call_operand.vmem [shape: f32[1,256], index: 5, kind: input, shape index: {}]   ;;  %s1481_s6 = inlined_call_operand.vmem [shape: f32[1,256], index: 6, kind: input, shape index: {}]   ;;  %s1482_s7 = inlined_call_operand.vmem [shape: f32[1,256], index: 7, kind: input, shape index: {}]   ;;  %s1483_s1 = inlined_call_operand.vmem [shape: s32[8,64], index: 1, kind: input, shape index: {}]   ;;  %s1484_s2 = inlined_call_operand.vmem [shape: s32[8,64], index: 2, kind: input, shape index: {}]   ;;  %s1485_s8 = inlined_call_operand.vmem [shape: bf16[64,32], index: 8, kind: input, shape index: {}]   ;;  %s1486_s9 = inlined_call_operand.vmem [shape: f32[1,32], index: 9, kind: input, shape index: {}]   ;;  %s1487_s10 = inlined_call_operand.vmem [shape: bf16[32,128], index: 10, kind: input, shape index: {}]   ;;  %s1488_s11 = inlined_call_operand.vmem [shape: f32[1,128], index: 11, kind: input, shape index: {}]   ;;  %s1489_s12 = inlined_call_operand.vmem [shape: f32[8,128], index: 12, kind: output, shape index: {}]  }
   0x1   :  { %v946_v0 = vld [vmem:[%s1477_s4 + $0x30] sm:$0xf]  ;;  %v1005_v1 = vld [vmem:[%s1477_s4 + $0x34] sm:$0xf0]  ;;  %v1004_v2 = vld [vmem:[%s1477_s4 + $0x34] sm:$0xf] }
   0x2   :  { %v1140_v3 = vor.u32 %v1005_v1, %v946_v0  ;;  %v948_v4 = vld [vmem:[%s1477_s4 + $0x38] sm:$0xf0]  ;;  %v52_v5 = vld [vmem:[%s1478_s3 + $0x10] sm:$0x33]  ;;  %v938_v6 = vld [vmem:[%s1477_s4 + $0x20] sm:$0xf] }
   0x3   :  { %v1151_v7 = vor.u32 %v1004_v2, %v948_v4  ;;  %v86_v8 = vunpack.c.l.b16 %v52_v5  ;;  %v87_v9 = vunpack.c.h.b16 %v52_v5  ;;  %v1003_v10 = vld [vmem:[%s1477_s4 + $0x24] sm:$0xf0]  ;;  %v1002_v11 = vld [vmem:[%s1477_s4 + $0x24] sm:$0xf]  ;;  %v940_v12 = vld [vmem:[%s1477_s4 + $0x28] sm:$0xf0] }
   0x4   :  { %254 = vmatpush.bf16.msra.mxu2 %v1140_v3  ;;  %v906_v13 = vld [vmem:[%s1478_s3] sm:$0xf]  ;;  %v997_v14 = vld [vmem:[%s1478_s3 + $0x4] sm:$0xf0]  ;;  %v1170_v17 = vor.u32 %v1003_v10, %v938_v6  ;;  %v1172_v18 = vor.u32 %v1002_v11, %v940_v12  ;;  %v996_v19 = vld [vmem:[%s1478_s3 + $0x4] sm:$0xf] }
   0x5   :  { %267 = vmatpush.bf16.msra.mxu3 %v1151_v7  ;;  %v90_v15 = vpack.c.b16 %v86_v8, %v86_v8  ;;  %v91_v16 = vpack.c.b16 %v87_v9, %v87_v9  ;;  %v908_v20 = vld [vmem:[%s1478_s3 + $0x8] sm:$0xf0]  ;;  %v930_v21 = vld [vmem:[%s1477_s4 + $0x10] sm:$0xf]  ;;  %v1001_v22 = vld [vmem:[%s1477_s4 + $0x14] sm:$0xf0]  ;;  %v907_v27 = vor.u32 %v997_v14, %v906_v13 }
   0x6   :  { %v1000_v23 = vld [vmem:[%s1477_s4 + $0x14] sm:$0xf]  ;;  %v932_v24 = vld [vmem:[%s1477_s4 + $0x18] sm:$0xf0]  ;;  %v911_v28 = vor.u32 %v996_v19, %v908_v20  ;;  %v1194_v29 = vor.u32 %v1001_v22, %v930_v21  ;;  %v922_v31 = vld [vmem:[%s1477_s4] sm:$0xf] }
   0x7   :  { %v109_v25 = vsel %vm107_vm0, %v90_v15, 0  ;;  %v112_v26 = vsel %vm107_vm0, %v91_v16, 0  ;;  %v1196_v30 = vor.u32 %v1000_v23, %v932_v24  ;;  %v999_v32 = vld [vmem:[%s1477_s4 + $0x4] sm:$0xf0]  ;;  %v998_v33 = vld [vmem:[%s1477_s4 + $0x4] sm:$0xf] }
   0x8   :  { %120 = vmatpush.bf16.msra.mxu0 %v109_v25  ;;  %149 = vmatpush.bf16.msra.mxu1 %v112_v26  ;;  %v924_v34 = vld [vmem:[%s1477_s4 + $0x8] sm:$0xf0]  ;;  %v992_v35 = vld [vmem:[%s1479_s0] sm:$0xff]  ;;  %v1215_v36 = vor.u32 %v999_v32, %v922_v31 }
   0x9   :  { %255 = vmatpush.bf16.msra.mxu2 %v1170_v17  ;;  %268 = vmatpush.bf16.msra.mxu3 %v1172_v18  ;;  %v1217_v37 = vor.u32 %v998_v33, %v924_v34  ;;  %v53_v39 = vld [vmem:[%s1480_s5] sm:$0x3] }
   0xa   :  { %v1258_v40 = vperm.slane %v53_v39, 0  ;;  %v1260_v41 = vperm.slane %v53_v39, 1  ;;  %v196_v53 = vld [vmem:[%s1481_s6] sm:$0x3]  ;;  %s1065_s6 = smov 64  }
   0xb   :  { %v197_v54 = vld [vmem:[%s1482_s7] sm:$0x3]  ;;  %v1270_v55 = vperm.slane %v196_v53, 0  ;;  %v1272_v56 = vperm.slane %v196_v53, 1 }
   0xc   :  { %121 = vmatpush.bf16.msra.mxu0 %v907_v27  ;;  %150 = vmatpush.bf16.msra.mxu1 %v911_v28  ;;  %v1274_v59 = vperm.slane %v197_v54, 0  ;;  %v1276_v61 = vperm.slane %v197_v54, 1  ;;  %v1288_v11 = vld [vmem:[%s1483_s1] sm:$0xff] }
   0xd   :  { %256 = vmatpush.bf16.msra.mxu2 %v1194_v29  ;;  %269 = vmatpush.bf16.msra.mxu3 %v1196_v30  ;;  %v1293_v12 = vld [vmem:[%s1484_s2] sm:$0xff]  ;;  %vm301_vm2 = vcmp.le.s32.totalorder %v1288_v11, 0  ;;  %vm369_vm6 = vcmp.le.s32.totalorder %v1288_v11, 1  ;;  %vm437_vm9 = vcmp.le.s32.totalorder %v1288_v11, 2  ;;  %vm505_vm12 = vcmp.le.s32.totalorder %v1288_v11, 3 }
   0xe   :  { %vm302_vm3 = vcmp.gt.s32.totalorder %v1293_v12, 0  ;;  %vm370_vm7 = vcmp.gt.s32.totalorder %v1293_v12, 1  ;;  %vm438_vm10 = vcmp.gt.s32.totalorder %v1293_v12, 2  ;;  %vm506_vm13 = vcmp.gt.s32.totalorder %v1293_v12, 3 }
   0xf   :  { %912 = vmatmul.msk.bf16.vlgmr.msra.gmra.mxu0 %vm94_vm1, %v992_v35  ;;  %916 = vmatmul.msk.bf16.vlgmr.msra.gmra.mxu1 %vm94_vm1, %v992_v35  ;;  %vm303_vm4 = vmand %vm301_vm2, %vm302_vm3  ;;  %vm573_vm15 = vcmp.le.s32.totalorder %v1288_v11, 4  ;;  %vm574_vm0 = vcmp.gt.s32.totalorder %v1293_v12, 4  ;;  %vm641_vm2 = vcmp.le.s32.totalorder %v1288_v11, 5  ;;  %vm642_vm3 = vcmp.gt.s32.totalorder %v1293_v12, 5 }
  0x10   :  { %532 = vmatpush.bf16.msrb.mxu0 %v1140_v3  ;;  %545 = vmatpush.bf16.msrb.mxu1 %v1151_v7  ;;  %vm371_vm8 = vmand %vm369_vm6, %vm370_vm7  ;;  %vm709_vm6 = vcmp.le.s32.totalorder %v1288_v11, 6  ;;  %vm710_vm7 = vcmp.gt.s32.totalorder %v1293_v12, 6 }
  0x11   :  { %257 = vmatpush.bf16.msra.mxu2 %v1215_v36  ;;  %270 = vmatpush.bf16.msra.mxu3 %v1217_v37  ;;  %vm439_vm11 = vmand %vm437_vm9, %vm438_vm10  ;;  %vm777_vm9 = vcmp.le.s32.totalorder %v1288_v11, 7  ;;  %vm778_vm10 = vcmp.gt.s32.totalorder %v1293_v12, 7  ;;  %v1015_v11 = vld [vmem:[%s1488_s11] ss:$0 sm:$0xff] }
  0x12   :  { %vm507_vm14 = vmand %vm505_vm12, %vm506_vm13  ;;  %vm859_vm12 = vcmask 261120  }
  0x14   :  { %533 = vmatpush.bf16.msrb.mxu0 %v1170_v17  ;;  %546 = vmatpush.bf16.msrb.mxu1 %v1172_v18 }
  0x15   :  { %328 = vmatpush.bf16.msrb.mxu2 %v1140_v3  ;;  %341 = vmatpush.bf16.msrb.mxu3 %v1151_v7 }
  0x16   :  { %258 = vmatmul.bf16.vlgmr.msra.gmra.mxu2 %v1064_v38  ;;  %271 = vmatmul.bf16.vlgmr.msra.gmra.mxu3 %v1064_v38 }
  0x18   :  { %534 = vmatpush.bf16.msrb.mxu0 %v1194_v29  ;;  %547 = vmatpush.bf16.msrb.mxu1 %v1196_v30 }
  0x19   :  { %329 = vmatpush.bf16.msrb.mxu2 %v1170_v17  ;;  %342 = vmatpush.bf16.msrb.mxu3 %v1172_v18 }
  0x1c   :  { %535 = vmatpush.bf16.msrb.mxu0 %v1215_v36  ;;  %548 = vmatpush.bf16.msrb.mxu1 %v1217_v37 }
  0x1d   :  { %330 = vmatpush.bf16.msrb.mxu2 %v1194_v29  ;;  %343 = vmatpush.bf16.msrb.mxu3 %v1196_v30 }
  0x20   :  { %668 = vmatpush.bf16.msra.mxu0 %v1140_v3  ;;  %681 = vmatpush.bf16.msra.mxu1 %v1151_v7 }
  0x21   :  { %331 = vmatpush.bf16.msrb.mxu2 %v1215_v36  ;;  %344 = vmatpush.bf16.msrb.mxu3 %v1217_v37 }
  0x24   :  { %669 = vmatpush.bf16.msra.mxu0 %v1170_v17  ;;  %682 = vmatpush.bf16.msra.mxu1 %v1172_v18 }
  0x25   :  { %396 = vmatpush.bf16.msra.mxu2 %v1140_v3  ;;  %409 = vmatpush.bf16.msra.mxu3 %v1151_v7 }
  0x28   :  { %670 = vmatpush.bf16.msra.mxu0 %v1194_v29  ;;  %683 = vmatpush.bf16.msra.mxu1 %v1196_v30 }
  0x29   :  { %397 = vmatpush.bf16.msra.mxu2 %v1170_v17  ;;  %410 = vmatpush.bf16.msra.mxu3 %v1172_v18 }
  0x2c   :  { %671 = vmatpush.bf16.msra.mxu0 %v1215_v36  ;;  %684 = vmatpush.bf16.msra.mxu1 %v1217_v37 }
  0x2d   :  { %398 = vmatpush.bf16.msra.mxu2 %v1194_v29  ;;  %411 = vmatpush.bf16.msra.mxu3 %v1196_v30 }
  0x31   :  { %399 = vmatpush.bf16.msra.mxu2 %v1215_v36  ;;  %412 = vmatpush.bf16.msra.mxu3 %v1217_v37 }
  0x8c   :  { %v123_v42 = vpop.f32.mrf.mxu0  ;;  %v152_v43 = vpop.f32.mrf.mxu1 }
  0x8d   :  { %v124_v44 = vadd.f32 %v123_v42, %v1258_v40  ;;  %v153_v45 = vadd.f32 %v152_v43, %v1260_v41 }
  0x8f   :  { %v172_v46 = vpack.c.bf16 %v153_v45, %v124_v44 }
  0x91   :  { %v204_v47 = vunpack.c.l.bf16 %v172_v46  ;;  %v205_v48 = vunpack.c.h.bf16 %v172_v46  ;;  %v993_v46 = vld [vmem:[%s1479_s0 + $0x8] sm:$0xff] }
  0x92   :  { %913 = vmatmul.msk.bf16.gmra.mxu0 %vm94_vm1, %v993_v46  ;;  %917 = vmatmul.msk.bf16.gmra.mxu1 %vm94_vm1, %v993_v46 }
  0x94   :  { %v125_v20 = vpop.f32.mrf.mxu0  ;;  %v154_v21 = vpop.f32.mrf.mxu1 }
  0x95   :  { %v126_v22 = vadd.f32 %v125_v20, %v1258_v40  ;;  %v155_v23 = vadd.f32 %v154_v21, %v1260_v41 }
  0x97   :  { %v173_v24 = vpack.c.bf16 %v155_v23, %v126_v22 }
  0x99   :  { %v259_v49 = vpop.f32.mrf.mxu2  ;;  %v272_v50 = vpop.f32.mrf.mxu3  ;;  %v318_v25 = vunpack.c.l.bf16 %v173_v24  ;;  %v319_v26 = vunpack.c.h.bf16 %v173_v24 }
  0x9a   :  { %v260_v51 = vadd.f32 %v259_v49, %v204_v47  ;;  %v273_v52 = vadd.f32 %v272_v50, %v205_v48 }
  0x9c   :  { %1016 = vtanh.f32 %v260_v51 }
  0x9d   :  { %1018 = vtanh.f32 %v273_v52 }
  0xa1   :  { %v261_v57 = vpop.f32.mrf.mxu2  ;;  %v274_v58 = vpop.f32.mrf.mxu3 }
  0xa2   :  { %v1017_v60 = vpop.eup %1016 }
  0xa3   :  { %v1019_v62 = vpop.eup %1018  ;;  %v283_v63 = vmul.f32 %v1017_v60, %v1270_v55 }
  0xa4   :  { %v284_v0 = vmul.f32 %v1019_v62, %v1272_v56 }
  0xa5   :  { %v290_v1 = vadd.f32 %v1274_v59, %v283_v63 }
  0xa6   :  { %v291_v2 = vadd.f32 %v1276_v61, %v284_v0 }
  0xa7   :  { %v292_v5 = vmul.f32 0.0, %v290_v1 }
  0xa8   :  { %v293_v4 = vmul.f32 %v291_v2, %v290_v1 }
  0xaa   :  { %295 = vrot.lane.b32.xlu0 %v293_v4, %s1065_s6 }
 0x10f   :  { %v128_v62 = vpop.f32.mrf.mxu0  ;;  %v157_v63 = vpop.f32.mrf.mxu1 }
 0x110   :  { %v129_v0 = vadd.f32 %v128_v62, %v1258_v40  ;;  %v158_v1 = vadd.f32 %v157_v63, %v1260_v41 }
 0x11c   :  { %v296_v6 = vpop.permute.xlu0 %295 }
 0x11d   :  { %v298_v8 = vadd.f32 %v296_v6, %v292_v5 }
 0x11f   :  { %1020 = vtanh.f32 %v298_v8  ;;  %310 = vrot.lane.b32.xlu1 %v298_v8, %s1065_s6 }
 0x125   :  { %v1021_v9 = vpop.eup %1020 }
 0x126   :  { %v300_v10 = vmul.f32 %v1021_v9, %v291_v2  ;;  %v174_v2 = vpack.c.bf16 %v158_v1, %v129_v0  ;;  %v995_v0 = vld [vmem:[%s1479_s0 + $0x18] sm:$0xff] }
 0x128   :  { %305 = vrot.lane.b32.xlu0 %v300_v10, %s1065_s6  ;;  %v386_v4 = vunpack.c.l.bf16 %v174_v2  ;;  %v387_v5 = vunpack.c.h.bf16 %v174_v2 }
 0x191   :  { %v311_v13 = vpop.permute.xlu1 %310 }
 0x192   :  { %v1297_v14 = vsel %vm303_vm4, %v311_v13, 0.0 }
 0x193   :  { %357 = vrot.lane.b32.xlu1 %v1297_v14, %s1065_s6 }
 0x19a   :  { %v306_v15 = vpop.permute.xlu0 %305 }
 0x19b   :  { %v308_v16 = vsel %vm303_vm4, %v306_v15, 0.0  ;;  %vm643_vm4 = vmand %vm641_vm2, %vm642_vm3 }
 0x19c   :  { %v320_v19 = vpack.c.bf16 %v308_v16, %v308_v16 }
 0x19e   :  { %952 = vmatmul.msk.bf16.vlgmr.msrb.gmra.mxu2 %vm246_vm5, %v320_v19  ;;  %953 = vmatmul.msk.bf16.vlgmr.msrb.gmra.mxu3 %vm246_vm5, %v320_v19 }
 0x19f   :  { %464 = vmatpush.bf16.msrb.mxu2 %v1140_v3  ;;  %477 = vmatpush.bf16.msrb.mxu3 %v1151_v7 }
 0x1a3   :  { %465 = vmatpush.bf16.msrb.mxu2 %v1170_v17  ;;  %478 = vmatpush.bf16.msrb.mxu3 %v1172_v18 }
 0x1a7   :  { %466 = vmatpush.bf16.msrb.mxu2 %v1194_v29  ;;  %479 = vmatpush.bf16.msrb.mxu3 %v1196_v30 }
 0x1ab   :  { %467 = vmatpush.bf16.msrb.mxu2 %v1215_v36  ;;  %480 = vmatpush.bf16.msrb.mxu3 %v1217_v37 }
 0x205   :  { %v358_v47 = vpop.permute.xlu1 %357 }
 0x221   :  { %v333_v27 = vpop.f32.mrf.mxu2  ;;  %v346_v28 = vpop.f32.mrf.mxu3 }
 0x222   :  { %v334_v31 = vadd.f32 %v333_v27, %v318_v25  ;;  %v347_v32 = vadd.f32 %v346_v28, %v319_v26 }
 0x224   :  { %1022 = vtanh.f32 %v334_v31 }
 0x225   :  { %1024 = vtanh.f32 %v347_v32 }
 0x229   :  { %v335_v33 = vpop.f32.mrf.mxu2  ;;  %v348_v34 = vpop.f32.mrf.mxu3 }
 0x22a   :  { %v1023_v35 = vpop.eup %1022 }
 0x22b   :  { %v1025_v38 = vpop.eup %1024  ;;  %v352_v39 = vmul.f32 %v1023_v35, %v1270_v55 }
 0x22c   :  { %v353_v42 = vmul.f32 %v1025_v38, %v1272_v56 }
 0x22d   :  { %v354_v43 = vadd.f32 %v352_v39, %v1274_v59  ;;  %v130_v39 = vpop.f32.mrf.mxu0 }
 0x22e   :  { %v355_v44 = vadd.f32 %v353_v42, %v1276_v61  ;;  %v159_v42 = vpop.f32.mrf.mxu1 }
 0x22f   :  { %v360_v48 = vmul.f32 %v358_v47, %v354_v43 }
 0x230   :  { %v361_v45 = vmul.f32 %v355_v44, %v354_v43  ;;  %v131_v43 = vadd.f32 %v130_v39, %v1258_v40 }
 0x232   :  { %363 = vrot.lane.b32.xlu2 %v361_v45, %s1065_s6 }
 0x28c   :  { %v364_v49 = vpop.permute.xlu2 %363 }
 0x28d   :  { %v366_v50 = vadd.f32 %v364_v49, %v360_v48 }
 0x28f   :  { %1026 = vtanh.f32 %v366_v50  ;;  %378 = vrot.lane.b32.xlu0 %v366_v50, %s1065_s6 }
 0x295   :  { %v1027_v51 = vpop.eup %1026 }
 0x296   :  { %v368_v52 = vmul.f32 %v1027_v51, %v355_v44 }
 0x298   :  { %373 = vrot.lane.b32.xlu2 %v368_v52, %s1065_s6 }
 0x2f2   :  { %v374_v53 = vpop.permute.xlu2 %373 }
 0x2f3   :  { %v376_v54 = vsel %vm371_vm8, %v374_v53, %v308_v16  ;;  %v994_v53 = vld [vmem:[%s1479_s0 + $0x10] sm:$0xff] }
 0x2f4   :  { %v388_v57 = vpack.c.bf16 %v376_v54, %v376_v54  ;;  %914 = vmatmul.msk.bf16.gmra.mxu0 %vm94_vm1, %v994_v53  ;;  %918 = vmatmul.msk.bf16.gmra.mxu1 %vm94_vm1, %v994_v53 }
 0x2f6   :  { %954 = vmatmul.msk.bf16.vlgmr.msra.gmra.mxu2 %vm246_vm5, %v388_v57  ;;  %955 = vmatmul.msk.bf16.vlgmr.msra.gmra.mxu3 %vm246_vm5, %v388_v57 }
 0x2f7   :  { %600 = vmatpush.bf16.msra.mxu2 %v1140_v3  ;;  %613 = vmatpush.bf16.msra.mxu3 %v1151_v7 }
 0x2fb   :  { %601 = vmatpush.bf16.msra.mxu2 %v1170_v17  ;;  %614 = vmatpush.bf16.msra.mxu3 %v1172_v18 }
 0x2ff   :  { %602 = vmatpush.bf16.msra.mxu2 %v1194_v29  ;;  %615 = vmatpush.bf16.msra.mxu3 %v1196_v30 }
 0x301   :  { %v379_v58 = vpop.permute.xlu0 %378 }
 0x302   :  { %v381_v60 = vsel %vm371_vm8, %v379_v58, %v1297_v14  ;;  %vm711_vm8 = vmand %vm709_vm6, %vm710_vm7 }
 0x303   :  { %425 = vrot.lane.b32.xlu1 %v381_v60, %s1065_s6  ;;  %603 = vmatpush.bf16.msra.mxu2 %v1215_v36 }
 0x304   :  { %616 = vmatpush.bf16.msra.mxu3 %v1217_v37  ;;  %915 = vmatmul.msk.bf16.gmra.mxu0 %vm94_vm1, %v995_v0 }
 0x305   :  { %919 = vmatmul.msk.bf16.gmra.mxu1 %vm94_vm1, %v995_v0  ;;  %vm575_vm1 = vmand %vm573_vm15, %vm574_vm0 }
 0x375   :  { %v426_v24 = vpop.permute.xlu1 %425 }
 0x379   :  { %v401_v6 = vpop.f32.mrf.mxu2  ;;  %v414_v8 = vpop.f32.mrf.mxu3 }
 0x37a   :  { %v402_v9 = vadd.f32 %v401_v6, %v386_v4  ;;  %v415_v10 = vadd.f32 %v414_v8, %v387_v5  ;;  %v133_v8 = vpop.f32.mrf.mxu0 }
 0x37c   :  { %1028 = vtanh.f32 %v402_v9  ;;  %v162_v9 = vpop.f32.mrf.mxu1 }
 0x37d   :  { %1030 = vtanh.f32 %v415_v10 }
 0x381   :  { %v403_v13 = vpop.f32.mrf.mxu2  ;;  %v416_v14 = vpop.f32.mrf.mxu3 }
 0x382   :  { %v1029_v15 = vpop.eup %1028  ;;  %v135_v10 = vpop.f32.mrf.mxu0 }
 0x383   :  { %v1031_v16 = vpop.eup %1030  ;;  %v420_v19 = vmul.f32 %v1029_v15, %v1270_v55  ;;  %v136_v14 = vadd.f32 %v135_v10, %v1258_v40 }
 0x384   :  { %v421_v20 = vmul.f32 %v1031_v16, %v1272_v56  ;;  %v164_v13 = vpop.f32.mrf.mxu1 }
 0x385   :  { %v422_v21 = vadd.f32 %v420_v19, %v1274_v59  ;;  %v165_v15 = vadd.f32 %v164_v13, %v1260_v41 }
 0x386   :  { %v423_v22 = vadd.f32 %v421_v20, %v1276_v61 }
 0x387   :  { %v428_v25 = vmul.f32 %v426_v24, %v422_v21  ;;  %v177_v16 = vpack.c.bf16 %v165_v15, %v136_v14 }
 0x388   :  { %v429_v23 = vmul.f32 %v423_v22, %v422_v21 }
 0x38a   :  { %431 = vrot.lane.b32.xlu2 %v429_v23, %s1065_s6  ;;  %v138_v19 = vpop.f32.mrf.mxu0 }
 0x38b   :  { %v139_v21 = vadd.f32 %v138_v19, %v1258_v40 }
 0x38c   :  { %v167_v20 = vpop.f32.mrf.mxu1 }
 0x392   :  { %v140_v24 = vpop.f32.mrf.mxu0 }
 0x3e4   :  { %v432_v26 = vpop.permute.xlu2 %431 }
 0x3e5   :  { %v434_v27 = vadd.f32 %v432_v26, %v428_v25  ;;  %v169_v25 = vpop.f32.mrf.mxu1  ;;  %v141_v26 = vadd.f32 %v140_v24, %v1258_v40 }
 0x3e7   :  { %1032 = vtanh.f32 %v434_v27  ;;  %446 = vrot.lane.b32.xlu1 %v434_v27, %s1065_s6  ;;  %v170_v27 = vadd.f32 %v169_v25, %v1260_v41 }
 0x3ed   :  { %v1033_v28 = vpop.eup %1032 }
 0x3ee   :  { %v436_v31 = vmul.f32 %v1033_v28, %v423_v22  ;;  %v168_v22 = vadd.f32 %v167_v20, %v1260_v41  ;;  %v1396_v28 = vpack.c.bf16 %v170_v27, %v141_v26 }
 0x3f0   :  { %441 = vrot.lane.b32.xlu0 %v436_v31, %s1065_s6  ;;  %v1392_v23 = vpack.c.bf16 %v168_v22, %v139_v21  ;;  %v134_v31 = vadd.f32 %v133_v8, %v1258_v40 }
 0x3f2   :  { %v658_v27 = vunpack.c.l.bf16 %v1392_v23 }
 0x459   :  { %v447_v32 = vpop.permute.xlu1 %446 }
 0x45a   :  { %v449_v33 = vsel %vm439_vm11, %v447_v32, %v381_v60  ;;  %v163_v32 = vadd.f32 %v162_v9, %v1260_v41 }
 0x45b   :  { %493 = vrot.lane.b32.xlu2 %v449_v33, %s1065_s6 }
 0x462   :  { %v442_v34 = vpop.permute.xlu0 %441 }
 0x463   :  { %v444_v35 = vsel %vm439_vm11, %v442_v34, %v376_v54  ;;  %vm779_vm11 = vmand %vm777_vm9, %vm778_vm10 }
 0x464   :  { %v456_v38 = vpack.c.bf16 %v444_v35, %v444_v35 }
 0x466   :  { %956 = vmatmul.msk.bf16.vlgmr.msrb.gmra.mxu2 %vm246_vm5, %v456_v38  ;;  %957 = vmatmul.msk.bf16.vlgmr.msrb.gmra.mxu3 %vm246_vm5, %v456_v38 }
 0x467   :  { %736 = vmatpush.bf16.msrb.mxu2 %v1140_v3  ;;  %749 = vmatpush.bf16.msrb.mxu3 %v1151_v7  ;;  %v160_v3 = vadd.f32 %v159_v42, %v1260_v41 }
 0x469   :  { %v175_v44 = vpack.c.bf16 %v160_v3, %v131_v43 }
 0x46b   :  { %737 = vmatpush.bf16.msrb.mxu2 %v1170_v17  ;;  %750 = vmatpush.bf16.msrb.mxu3 %v1172_v18  ;;  %v454_v7 = vunpack.c.l.bf16 %v175_v44  ;;  %v455_v45 = vunpack.c.h.bf16 %v175_v44 }
 0x46f   :  { %738 = vmatpush.bf16.msrb.mxu2 %v1194_v29  ;;  %751 = vmatpush.bf16.msrb.mxu3 %v1196_v30 }
 0x473   :  { %739 = vmatpush.bf16.msrb.mxu2 %v1215_v36  ;;  %752 = vmatpush.bf16.msrb.mxu3 %v1217_v37 }
 0x4b5   :  { %v494_v54 = vpop.permute.xlu2 %493 }
 0x4e9   :  { %v469_v17 = vpop.f32.mrf.mxu2  ;;  %v482_v46 = vpop.f32.mrf.mxu3 }
 0x4ea   :  { %v470_v18 = vadd.f32 %v469_v17, %v454_v7  ;;  %v483_v47 = vadd.f32 %v482_v46, %v455_v45 }
 0x4ec   :  { %1034 = vtanh.f32 %v470_v18 }
 0x4ed   :  { %1036 = vtanh.f32 %v483_v47 }
 0x4f1   :  { %v471_v29 = vpop.f32.mrf.mxu2  ;;  %v484_v30 = vpop.f32.mrf.mxu3 }
 0x4f2   :  { %v1035_v36 = vpop.eup %1034 }
 0x4f3   :  { %v1037_v48 = vpop.eup %1036  ;;  %v488_v37 = vmul.f32 %v1035_v36, %v1270_v55 }
 0x4f4   :  { %v489_v49 = vmul.f32 %v1037_v48, %v1272_v56 }
 0x4f5   :  { %v490_v50 = vadd.f32 %v488_v37, %v1274_v59 }
 0x4f6   :  { %v491_v51 = vadd.f32 %v489_v49, %v1276_v61 }
 0x4f7   :  { %v496_v57 = vmul.f32 %v494_v54, %v490_v50  ;;  %v590_v54 = vunpack.c.l.bf16 %v177_v16 }
 0x4f8   :  { %v497_v52 = vmul.f32 %v491_v51, %v490_v50 }
 0x4fa   :  { %499 = vrot.lane.b32.xlu0 %v497_v52, %s1065_s6 }
 0x56c   :  { %v500_v58 = vpop.permute.xlu0 %499 }
 0x56d   :  { %v502_v60 = vadd.f32 %v500_v58, %v496_v57  ;;  %v591_v57 = vunpack.c.h.bf16 %v177_v16 }
 0x56f   :  { %1038 = vtanh.f32 %v502_v60  ;;  %514 = vrot.lane.b32.xlu2 %v502_v60, %s1065_s6 }
 0x575   :  { %v1039_v62 = vpop.eup %1038 }
 0x576   :  { %v504_v63 = vmul.f32 %v1039_v62, %v491_v51 }
 0x578   :  { %509 = vrot.lane.b32.xlu1 %v504_v63, %s1065_s6 }
 0x5c9   :  { %v515_v1 = vpop.permute.xlu2 %514 }
 0x5ca   :  { %v1382_v2 = vsel %vm507_vm14, %v515_v1, %v449_v33  ;;  %v176_v33 = vpack.c.bf16 %v163_v32, %v134_v31  ;;  %v659_v31 = vunpack.c.h.bf16 %v1392_v23 }
 0x5cb   :  { %561 = vrot.lane.b32.xlu0 %v1382_v2, %s1065_s6 }
 0x5cc   :  { %v522_v34 = vunpack.c.l.bf16 %v176_v33 }
 0x5ea   :  { %v510_v4 = vpop.permute.xlu1 %509 }
 0x5eb   :  { %v512_v5 = vsel %vm507_vm14, %v510_v4, %v444_v35  ;;  %v523_v35 = vunpack.c.h.bf16 %v176_v33 }
 0x5ec   :  { %v524_v6 = vpack.c.bf16 %v512_v5, %v512_v5 }
 0x5ee   :  { %958 = vmatmul.msk.bf16.vlgmr.msrb.gmra.mxu0 %vm246_vm5, %v524_v6  ;;  %959 = vmatmul.msk.bf16.vlgmr.msrb.gmra.mxu1 %vm246_vm5, %v524_v6 }
 0x63d   :  { %v562_v47 = vpop.permute.xlu0 %561 }
 0x66b   :  { %v537_v38 = vpop.f32.mrf.mxu0  ;;  %v550_v39 = vpop.f32.mrf.mxu1 }
 0x66c   :  { %v538_v42 = vadd.f32 %v537_v38, %v522_v34  ;;  %v551_v43 = vadd.f32 %v550_v39, %v523_v35 }
 0x66e   :  { %1040 = vtanh.f32 %v538_v42 }
 0x66f   :  { %1042 = vtanh.f32 %v551_v43 }
 0x673   :  { %v539_v3 = vpop.f32.mrf.mxu0  ;;  %v552_v44 = vpop.f32.mrf.mxu1 }
 0x674   :  { %v1041_v7 = vpop.eup %1040 }
 0x675   :  { %v1043_v45 = vpop.eup %1042  ;;  %v556_v17 = vmul.f32 %v1041_v7, %v1270_v55 }
 0x676   :  { %v557_v46 = vmul.f32 %v1043_v45, %v1272_v56 }
 0x677   :  { %v558_v40 = vadd.f32 %v556_v17, %v1274_v59 }
 0x678   :  { %v559_v41 = vadd.f32 %v557_v46, %v1276_v61 }
 0x679   :  { %v564_v29 = vmul.f32 %v562_v47, %v558_v40 }
 0x67a   :  { %v565_v18 = vmul.f32 %v559_v41, %v558_v40 }
 0x67c   :  { %567 = vrot.lane.b32.xlu1 %v565_v18, %s1065_s6 }
 0x6ee   :  { %v568_v30 = vpop.permute.xlu1 %567 }
 0x6ef   :  { %v570_v36 = vadd.f32 %v568_v30, %v564_v29 }
 0x6f1   :  { %1044 = vtanh.f32 %v570_v36  ;;  %582 = vrot.lane.b32.xlu0 %v570_v36, %s1065_s6 }
 0x6f7   :  { %v1045_v48 = vpop.eup %1044 }
 0x6f8   :  { %v572_v37 = vmul.f32 %v1045_v48, %v559_v41 }
 0x6fa   :  { %577 = vrot.lane.b32.xlu2 %v572_v37, %s1065_s6 }
 0x754   :  { %v578_v49 = vpop.permute.xlu2 %577 }
 0x755   :  { %v580_v50 = vsel %vm575_vm1, %v578_v49, %v512_v5  ;;  %v726_v49 = vunpack.c.l.bf16 %v1396_v28 }
 0x756   :  { %v592_v51 = vpack.c.bf16 %v580_v50, %v580_v50 }
 0x758   :  { %960 = vmatmul.msk.bf16.vlgmr.msra.gmra.mxu2 %vm246_vm5, %v592_v51  ;;  %961 = vmatmul.msk.bf16.vlgmr.msra.gmra.mxu3 %vm246_vm5, %v592_v51 }
 0x763   :  { %v583_v52 = vpop.permute.xlu0 %582 }
 0x764   :  { %v585_v53 = vsel %vm575_vm1, %v583_v52, %v1382_v2 }
 0x765   :  { %629 = vrot.lane.b32.xlu1 %v585_v53, %s1065_s6 }
 0x7d7   :  { %v630_v13 = vpop.permute.xlu1 %629 }
 0x7db   :  { %v605_v58 = vpop.f32.mrf.mxu2  ;;  %v618_v60 = vpop.f32.mrf.mxu3 }
 0x7dc   :  { %v606_v62 = vadd.f32 %v605_v58, %v590_v54  ;;  %v619_v63 = vadd.f32 %v618_v60, %v591_v57 }
 0x7de   :  { %1046 = vtanh.f32 %v606_v62 }
 0x7df   :  { %1048 = vtanh.f32 %v619_v63 }
 0x7e3   :  { %v607_v0 = vpop.f32.mrf.mxu2  ;;  %v620_v1 = vpop.f32.mrf.mxu3 }
 0x7e4   :  { %v1047_v4 = vpop.eup %1046 }
 0x7e5   :  { %v1049_v5 = vpop.eup %1048  ;;  %v624_v6 = vmul.f32 %v1047_v4, %v1270_v55 }
 0x7e6   :  { %v625_v8 = vmul.f32 %v1049_v5, %v1272_v56 }
 0x7e7   :  { %v626_v2 = vadd.f32 %v624_v6, %v1274_v59  ;;  %v1008_v6 = vld [vmem:[%s1485_s8 + $0x10] sm:$0xff] }
 0x7e8   :  { %v627_v9 = vadd.f32 %v625_v8, %v1276_v61 }
 0x7e9   :  { %v632_v14 = vmul.f32 %v630_v13, %v626_v2  ;;  %v1011_v13 = vld [vmem:[%s1487_s10 + $0x8] sm:$0xff] }
 0x7ea   :  { %v633_v10 = vmul.f32 %v627_v9, %v626_v2  ;;  %869 = vmatpush.bf16.msrb.mxu1 %v1011_v13 }
 0x7ec   :  { %635 = vrot.lane.b32.xlu2 %v633_v10, %s1065_s6 }
 0x846   :  { %v636_v15 = vpop.permute.xlu2 %635 }
 0x847   :  { %v638_v16 = vadd.f32 %v636_v15, %v632_v14  ;;  %v1010_v14 = vld [vmem:[%s1487_s10] sm:$0xff] }
 0x848   :  { %870 = vmatpush.bf16.msrb.mxu1 %v1010_v14 }
 0x849   :  { %1050 = vtanh.f32 %v638_v16  ;;  %650 = vrot.lane.b32.xlu1 %v638_v16, %s1065_s6 }
 0x84f   :  { %v1051_v19 = vpop.eup %1050 }
 0x850   :  { %v640_v20 = vmul.f32 %v1051_v19, %v627_v9 }
 0x852   :  { %645 = vrot.lane.b32.xlu0 %v640_v20, %s1065_s6  ;;  %v1014_v20 = vld [vmem:[%s1486_s9] ss:$0 sm:$0xff] }
 0x8bb   :  { %v651_v21 = vpop.permute.xlu1 %650 }
 0x8bc   :  { %v653_v22 = vsel %vm643_vm4, %v651_v21, %v585_v53 }
 0x8bd   :  { %697 = vrot.lane.b32.xlu2 %v653_v22, %s1065_s6 }
 0x8c4   :  { %v646_v24 = vpop.permute.xlu0 %645 }
 0x8c5   :  { %v648_v25 = vsel %vm643_vm4, %v646_v24, %v580_v50  ;;  %v727_v50 = vunpack.c.h.bf16 %v1396_v28  ;;  %v1009_v28 = vld [vmem:[%s1485_s8 + $0x18] sm:$0xff] }
 0x8c6   :  { %v660_v26 = vpack.c.bf16 %v648_v25, %v648_v25  ;;  %829 = vmatpush.bf16.msrb.mxu0 %v1009_v28 }
 0x8c8   :  { %962 = vmatmul.msk.bf16.vlgmr.msra.gmra.mxu0 %vm246_vm5, %v660_v26  ;;  %963 = vmatmul.msk.bf16.vlgmr.msra.gmra.mxu1 %vm246_vm5, %v660_v26 }
 0x8ca   :  { %830 = vmatpush.bf16.msrb.mxu0 %v1008_v6 }
 0x917   :  { %v698_v23 = vpop.permute.xlu2 %697 }
 0x945   :  { %v673_v32 = vpop.f32.mrf.mxu0  ;;  %v686_v33 = vpop.f32.mrf.mxu1 }
 0x946   :  { %v674_v34 = vadd.f32 %v673_v32, %v658_v27  ;;  %v687_v35 = vadd.f32 %v686_v33, %v659_v31 }
 0x948   :  { %1052 = vtanh.f32 %v674_v34 }
 0x949   :  { %1054 = vtanh.f32 %v687_v35 }
 0x94d   :  { %v675_v38 = vpop.f32.mrf.mxu0  ;;  %v688_v39 = vpop.f32.mrf.mxu1 }
 0x94e   :  { %v1053_v42 = vpop.eup %1052 }
 0x94f   :  { %v1055_v43 = vpop.eup %1054  ;;  %v692_v3 = vmul.f32 %v1053_v42, %v1270_v55 }
 0x950   :  { %v693_v44 = vmul.f32 %v1055_v43, %v1272_v56 }
 0x951   :  { %v694_v7 = vadd.f32 %v692_v3, %v1274_v59 }
 0x952   :  { %v695_v45 = vadd.f32 %v693_v44, %v1276_v61 }
 0x953   :  { %v700_v46 = vmul.f32 %v698_v23, %v694_v7 }
 0x954   :  { %v701_v17 = vmul.f32 %v695_v45, %v694_v7 }
 0x956   :  { %703 = vrot.lane.b32.xlu0 %v701_v17, %s1065_s6 }
 0x9c8   :  { %v704_v40 = vpop.permute.xlu0 %703 }
 0x9c9   :  { %v706_v41 = vadd.f32 %v704_v40, %v700_v46 }
 0x9cb   :  { %1056 = vtanh.f32 %v706_v41  ;;  %718 = vrot.lane.b32.xlu2 %v706_v41, %s1065_s6 }
 0x9d1   :  { %v1057_v18 = vpop.eup %1056 }
 0x9d2   :  { %v708_v47 = vmul.f32 %v1057_v18, %v695_v45 }
 0x9d4   :  { %713 = vrot.lane.b32.xlu1 %v708_v47, %s1065_s6 }
 0xa25   :  { %v719_v29 = vpop.permute.xlu2 %718 }
 0xa26   :  { %v721_v30 = vsel %vm711_vm8, %v719_v29, %v653_v22 }
 0xa27   :  { %765 = vrot.lane.b32.xlu0 %v721_v30, %s1065_s6 }
 0xa46   :  { %v714_v36 = vpop.permute.xlu1 %713 }
 0xa47   :  { %v716_v48 = vsel %vm711_vm8, %v714_v36, %v648_v25 }
 0xa48   :  { %v728_v37 = vpack.c.bf16 %v716_v48, %v716_v48 }
 0xa4a   :  { %964 = vmatmul.msk.bf16.vlgmr.msrb.gmra.mxu2 %vm246_vm5, %v728_v37  ;;  %965 = vmatmul.msk.bf16.vlgmr.msrb.gmra.mxu3 %vm246_vm5, %v728_v37 }
 0xacd   :  { %v741_v51 = vpop.f32.mrf.mxu2  ;;  %v754_v52 = vpop.f32.mrf.mxu3 }
 0xace   :  { %v742_v53 = vadd.f32 %v741_v51, %v726_v49  ;;  %v755_v54 = vadd.f32 %v754_v52, %v727_v50 }
 0xad0   :  { %1058 = vtanh.f32 %v742_v53 }
 0xad1   :  { %1060 = vtanh.f32 %v755_v54 }
 0xad5   :  { %v743_v57 = vpop.f32.mrf.mxu2  ;;  %v756_v58 = vpop.f32.mrf.mxu3 }
 0xad6   :  { %v1059_v60 = vpop.eup %1058 }
 0xad7   :  { %v1061_v62 = vpop.eup %1060  ;;  %v760_v63 = vmul.f32 %v1059_v60, %v1270_v55  ;;  %v1007_v55 = vld [vmem:[%s1485_s8 + $0x8] sm:$0xff] }
 0xad8   :  { %v761_v0 = vmul.f32 %v1061_v62, %v1272_v56  ;;  %831 = vmatpush.bf16.msrb.mxu0 %v1007_v55  ;;  %v1006_v56 = vld [vmem:[%s1485_s8] sm:$0xff] }
 0xad9   :  { %v762_v1 = vadd.f32 %v760_v63, %v1274_v59  ;;  %v766_v59 = vpop.permute.xlu0 %765 }
 0xada   :  { %v763_v4 = vadd.f32 %v761_v0, %v1276_v61 }
 0xadb   :  { %v768_v61 = vmul.f32 %v766_v59, %v762_v1 }
 0xadc   :  { %v769_v5 = vmul.f32 %v763_v4, %v762_v1  ;;  %832 = vmatpush.bf16.msrb.mxu0 %v1006_v56 }
 0xade   :  { %771 = vrot.lane.b32.xlu1 %v769_v5, %s1065_s6 }
 0xb50   :  { %v772_v8 = vpop.permute.xlu1 %771 }
 0xb51   :  { %v774_v2 = vadd.f32 %v772_v8, %v768_v61 }
 0xb53   :  { %1062 = vtanh.f32 %v774_v2 }
 0xb59   :  { %v1063_v9 = vpop.eup %1062 }
 0xb5a   :  { %v776_v10 = vmul.f32 %v1063_v9, %v763_v4 }
 0xb5c   :  { %781 = vrot.lane.b32.xlu2 %v776_v10, %s1065_s6 }
 0xbb6   :  { %v782_v15 = vpop.permute.xlu2 %781 }
 0xbb7   :  { %v784_v16 = vsel %vm779_vm11, %v782_v15, %v716_v48 }
 0xbb8   :  { %v785_v19 = vpack.c.bf16 %v784_v16, %v784_v16 }
 0xbba   :  { %982 = vmatmul.msk.bf16.vlgmr.msrb.gmra.mxu0 %vm246_vm5, %v785_v19 }
 0xc37   :  { %v834_v21 = vpop.f32.mrf.mxu0 }
 0xc38   :  { %v835_v22 = vadd.f32 %v1014_v20, %v834_v21 }
 0xc3a   :  { %v838_v24 = vpack.c.bf16 %v835_v22, %v835_v22 }
 0xc3c   :  { %991 = vmatmul.msk.bf16.vlgmr.msrb.gmra.mxu1 %vm859_vm12, %v838_v24 }
 0xc3f   :  { %v836_v25 = vpop.f32.mrf.mxu0 }
 0xcb9   :  { %v872_v12 = vpop.f32.mrf.mxu1 }
 0xcba   :  { %v873_v26 = vadd.f32 %v1015_v11, %v872_v12 }
 0xcbc   :  { %876 = vst [vmem:[%s1489_s12] sm:$0xff] %v873_v26 }
 0xcc1   :  { %v874_v27 = vpop.f32.mrf.mxu1 }

</bundles_post_ra>
